<compile_context>
chip_gen: v5e
topology: v5e:2x2
jax: 0.10.0
libtpu: 0.0.40
codegen_flags: <defaults>
</compile_context>

<pallas_src>
import jax
import jax.numpy as jnp
from jax.experimental import pallas as pl
from jax.experimental.pallas import tpu as pltpu


def neural_modal_odefunc_kernel(zq_ref, M_ref, w1_ref, b1_ref, w2_ref, b2_ref,
                                w3p_ref, b3p_ref, out_ref):
    """One batch tile resident in VMEM.

    zq_ref : [TB, 2n]       M_ref  : [2n, 2n]  (fused passthrough + physics)
    w1_ref : [2n, H]        b1_ref : [1, H]
    w2_ref : [H,  H]        b2_ref : [1, H]
    w3p_ref: [H, 2n]        b3p_ref: [1, 2n]   (last layer zero-padded to 2n lanes)
    out_ref: [TB, 2n]
    """
    zq = zq_ref[...]                                   # [TB, 2n]
    two_n = zq.shape[1]

    # Layer 1: K = 2n (= 4) is tiny -> 2n VPU broadcast-FMAs, bias folded in.
    h1 = b1_ref[...] + zq[:, 0:1] * w1_ref[0:1, :]
    for k in range(1, two_n):
        h1 = h1 + zq[:, k:k + 1] * w1_ref[k:k + 1, :]
    h1 = jnp.maximum(h1, 0.0)

    # Hidden layer: 128x128, native MXU tile, f32 accumulation.
    h2 = jnp.dot(h1, w2_ref[...], preferred_element_type=jnp.float32) + b2_ref[...]
    h2 = jnp.maximum(h2, 0.0)

    # Output layer, already padded to 2n lanes (first n columns are zero).
    net = jnp.dot(h2, w3p_ref[...], preferred_element_type=jnp.float32) + b3p_ref[...]

    # Structured linear term: qd passthrough + zq @ A.T, as 2n broadcast-FMAs.
    lin = zq[:, 0:1] * M_ref[0:1, :]
    for k in range(1, two_n):
        lin = lin + zq[:, k:k + 1] * M_ref[k:k + 1, :]

    # Single lane-dense, full-ref store.
    out_ref[...] = net + lin


def prepare_params(params):
    """One-time layout prep (hoisted out of the per-call hot path).

    Input params are in PyTorch layout:
      A [n, 2n], wX [out, in], bX [out].
    Returns kernel-layout params:
      M [2n, 2n], w1T [2n, H], b1 [1, H], w2T [H, H], b2 [1, H],
      w3_pad [H, 2n], b3_pad [1, 2n].
    """
    A, w1, b1, w2, b2, w3, b3 = params
    n, z_dim = A.shape
    # zq @ M == cat([zq[:, n:], zq @ A.T], axis=-1)
    M = jnp.zeros((z_dim, z_dim), dtype=jnp.float32)
    M = M.at[n:, :n].set(jnp.eye(n, dtype=jnp.float32))
    M = M.at[:, n:].set(A.T)
    # Pad the last trans_net layer so it directly produces [B, 2n].
    w3_pad = jnp.zeros((w3.shape[1], z_dim), dtype=jnp.float32).at[:, n:].set(w3.T)
    b3_pad = jnp.zeros((1, z_dim), dtype=jnp.float32).at[:, n:].set(b3)
    return (M,
            jnp.asarray(w1.T, jnp.float32), b1.reshape(1, -1).astype(jnp.float32),
            jnp.asarray(w2.T, jnp.float32), b2.reshape(1, -1).astype(jnp.float32),
            w3_pad, b3_pad)


def neural_modal_odefunc(zq, prepared, *, block_b=128):
    """Invoke the Pallas kernel over a 1-D parallel grid on the batch axis."""
    M, w1T, b1, w2T, b2, w3_pad, b3_pad = prepared
    B, z_dim = zq.shape
    H = w1T.shape[1]

    if B % block_b != 0 or B < block_b:
        block_b = B  # single-tile fallback (block == full dims satisfies (8,128) rule)
    grid = (B // block_b,)

    def whole(shape):
        # weights: whole array, same block every program -> stays VMEM-resident
        return pl.BlockSpec(shape, lambda i: (0,) * len(shape))

    cost = pl.CostEstimate(
        flops=2 * B * (z_dim * H + H * H + H * z_dim + z_dim * z_dim),
        transcendentals=0,
        bytes_accessed=4 * (2 * B * z_dim + z_dim * z_dim + z_dim * H + H
                            + H * H + H + H * z_dim + z_dim),
    )

    return pl.pallas_call(
        neural_modal_odefunc_kernel,
        out_shape=jax.ShapeDtypeStruct((B, z_dim), jnp.float32),
        grid=grid,
        in_specs=[
            pl.BlockSpec((block_b, z_dim), lambda i: (i, 0)),   # zq tile
            whole(M.shape),
            whole(w1T.shape), whole(b1.shape),
            whole(w2T.shape), whole(b2.shape),
            whole(w3_pad.shape), whole(b3_pad.shape),
        ],
        out_specs=pl.BlockSpec((block_b, z_dim), lambda i: (i, 0)),
        compiler_params=pltpu.CompilerParams(dimension_semantics=("parallel",)),
        cost_estimate=cost,
    )(zq, M, w1T, b1, w2T, b2, w3_pad, b3_pad)


def make_params(key, hidden_ndof=2, hidden_dim=128):
    """Deterministic synthetic parameters matching the module's __init__ shapes
    (PyTorch layout: weight [out, in], bias [out])."""
    n = hidden_ndof
    z_dim = 2 * n
    ks = jax.random.split(key, 8)

    # Physics parameters (Omega, Xi) -> trans_A weight A = [-K, -C], shape [n, 2n]
    omega = jax.random.uniform(ks[0], (n,), minval=1.0, maxval=5.0)
    xi = jax.random.uniform(ks[1], (n,), minval=0.01, maxval=0.1)
    K = jnp.diag(omega ** 2)
    C = jnp.diag(2.0 * xi * omega)
    A = jnp.concatenate([-K, -C], axis=1).astype(jnp.float32)    # [n, 2n]

    def linear(kw, kb, out_f, in_f):
        bound = 1.0 / jnp.sqrt(in_f)
        w = jax.random.uniform(kw, (out_f, in_f), minval=-bound, maxval=bound)
        b = jax.random.uniform(kb, (out_f,), minval=-bound, maxval=bound)
        return w.astype(jnp.float32), b.astype(jnp.float32)

    w1, b1 = linear(ks[2], ks[3], hidden_dim, z_dim)
    w2, b2 = linear(ks[4], ks[5], hidden_dim, hidden_dim)
    w3, b3 = linear(ks[6], ks[7], n, hidden_dim)
    # NOTE: Phi_net_encoder / Phi_decoder are defined in __init__ but unused in forward().
    return (A, w1, b1, w2, b2, w3, b3)


def reference_forward(zq, params):
    """Pure-JAX reference of the PyTorch forward, for a correctness check."""
    A, w1, b1, w2, b2, w3, b3 = params
    n = A.shape[0]
    qd = zq[:, n:]
    h1 = jnp.maximum(zq @ w1.T + b1, 0.0)
    h2 = jnp.maximum(h1 @ w2.T + b2, 0.0)
    net_out = h2 @ w3.T + b3
    phys_out = zq @ A.T
    return jnp.concatenate([qd, phys_out + net_out], axis=-1)


if __name__ == "__main__":
    hidden_ndof = 2
    hidden_dim = 128
    z_dim = 2 * hidden_ndof
    B = 256  # batch of latent ODE states -> grid=(2,), 128 rows per parallel program

    key = jax.random.PRNGKey(0)
    k_params, k_zq = jax.random.split(key)
    params = make_params(k_params, hidden_ndof=hidden_ndof, hidden_dim=hidden_dim)
    prepared = prepare_params(params)          # one-time layout prep, outside hot path
    zq = jax.random.normal(k_zq, (B, z_dim), dtype=jnp.float32)

    out = neural_modal_odefunc(zq, prepared)
    out = jax.block_until_ready(out)

    ref = reference_forward(zq, params)
    assert out.shape == (B, z_dim)
    assert jnp.allclose(out, ref, atol=1e-4, rtol=1e-5)

    print("KERNEL_OK")
</pallas_src>

<mosaic_0001>
module attributes {stable_mosaic.version = 11 : i64} {
  func.func @neural_modal_odefunc_kernel(%arg0: i32, %arg1: memref<128x4xf32, #tpu.memory_space<vmem>>, %arg2: memref<4x4xf32, #tpu.memory_space<vmem>>, %arg3: memref<4x128xf32, #tpu.memory_space<vmem>>, %arg4: memref<1x128xf32, #tpu.memory_space<vmem>>, %arg5: memref<128x128xf32, #tpu.memory_space<vmem>>, %arg6: memref<1x128xf32, #tpu.memory_space<vmem>>, %arg7: memref<128x4xf32, #tpu.memory_space<vmem>>, %arg8: memref<1x4xf32, #tpu.memory_space<vmem>>, %arg9: memref<128x4xf32, #tpu.memory_space<vmem>>) attributes {dimension_semantics = [#tpu.dimension_semantics<parallel>], iteration_bounds = array<i64: 2>, scalar_prefetch = 0 : i64, scratch_operands = 0 : i64, tpu.core_type = #tpu.core_type<tc>, window_params = [{transform_indices = @transform_0, window_bounds = array<i64: 128, 4>}, {pipeline_mode = #tpu.pipeline_mode<synchronous>, transform_indices = @transform_1, window_bounds = array<i64: 4, 4>}, {pipeline_mode = #tpu.pipeline_mode<synchronous>, transform_indices = @transform_2, window_bounds = array<i64: 4, 128>}, {pipeline_mode = #tpu.pipeline_mode<synchronous>, transform_indices = @transform_3, window_bounds = array<i64: 1, 128>}, {pipeline_mode = #tpu.pipeline_mode<synchronous>, transform_indices = @transform_4, window_bounds = array<i64: 128, 128>}, {pipeline_mode = #tpu.pipeline_mode<synchronous>, transform_indices = @transform_5, window_bounds = array<i64: 1, 128>}, {pipeline_mode = #tpu.pipeline_mode<synchronous>, transform_indices = @transform_6, window_bounds = array<i64: 128, 4>}, {pipeline_mode = #tpu.pipeline_mode<synchronous>, transform_indices = @transform_7, window_bounds = array<i64: 1, 4>}, {transform_indices = @transform_8, window_bounds = array<i64: 128, 4>}]} {
    %c0 = arith.constant 0 : index
    %c0_0 = arith.constant 0 : index
    %0 = vector.load %arg1[%c0, %c0_0] : memref<128x4xf32, #tpu.memory_space<vmem>>, vector<128x4xf32>
    %c0_1 = arith.constant 0 : index
    %c0_2 = arith.constant 0 : index
    %1 = vector.load %arg4[%c0_1, %c0_2] : memref<1x128xf32, #tpu.memory_space<vmem>>, vector<1x128xf32>
    %2 = vector.extract_strided_slice %0 {offsets = [0, 0], sizes = [128, 1], strides = [1, 1]} : vector<128x4xf32> to vector<128x1xf32>
    %c0_3 = arith.constant 0 : index
    %c0_4 = arith.constant 0 : index
    %3 = vector.load %arg3[%c0_3, %c0_4] : memref<4x128xf32, #tpu.memory_space<vmem>>, vector<1x128xf32>
    %4 = vector.broadcast %2 : vector<128x1xf32> to vector<128x128xf32>
    %5 = vector.broadcast %3 : vector<1x128xf32> to vector<128x128xf32>
    %6 = arith.mulf %4, %5 : vector<128x128xf32>
    %7 = vector.broadcast %1 : vector<1x128xf32> to vector<128x128xf32>
    %8 = arith.addf %7, %6 : vector<128x128xf32>
    %9 = vector.extract_strided_slice %0 {offsets = [0, 1], sizes = [128, 1], strides = [1, 1]} : vector<128x4xf32> to vector<128x1xf32>
    %c1 = arith.constant 1 : index
    %c0_5 = arith.constant 0 : index
    %10 = vector.load %arg3[%c1, %c0_5] : memref<4x128xf32, #tpu.memory_space<vmem>>, vector<1x128xf32>
    %11 = vector.broadcast %9 : vector<128x1xf32> to vector<128x128xf32>
    %12 = vector.broadcast %10 : vector<1x128xf32> to vector<128x128xf32>
    %13 = arith.mulf %11, %12 : vector<128x128xf32>
    %14 = arith.addf %8, %13 : vector<128x128xf32>
    %15 = vector.extract_strided_slice %0 {offsets = [0, 2], sizes = [128, 1], strides = [1, 1]} : vector<128x4xf32> to vector<128x1xf32>
    %c2 = arith.constant 2 : index
    %c0_6 = arith.constant 0 : index
    %16 = vector.load %arg3[%c2, %c0_6] : memref<4x128xf32, #tpu.memory_space<vmem>>, vector<1x128xf32>
    %17 = vector.broadcast %15 : vector<128x1xf32> to vector<128x128xf32>
    %18 = vector.broadcast %16 : vector<1x128xf32> to vector<128x128xf32>
    %19 = arith.mulf %17, %18 : vector<128x128xf32>
    %20 = arith.addf %14, %19 : vector<128x128xf32>
    %21 = vector.extract_strided_slice %0 {offsets = [0, 3], sizes = [128, 1], strides = [1, 1]} : vector<128x4xf32> to vector<128x1xf32>
    %c3 = arith.constant 3 : index
    %c0_7 = arith.constant 0 : index
    %22 = vector.load %arg3[%c3, %c0_7] : memref<4x128xf32, #tpu.memory_space<vmem>>, vector<1x128xf32>
    %23 = vector.broadcast %21 : vector<128x1xf32> to vector<128x128xf32>
    %24 = vector.broadcast %22 : vector<1x128xf32> to vector<128x128xf32>
    %25 = arith.mulf %23, %24 : vector<128x128xf32>
    %26 = arith.addf %20, %25 : vector<128x128xf32>
    %cst = arith.constant 0.000000e+00 : f32
    %27 = vector.broadcast %cst : f32 to vector<128x128xf32>
    %28 = arith.maximumf %26, %27 : vector<128x128xf32>
    %c0_8 = arith.constant 0 : index
    %c0_9 = arith.constant 0 : index
    %29 = vector.load %arg5[%c0_8, %c0_9] : memref<128x128xf32, #tpu.memory_space<vmem>>, vector<128x128xf32>
    %cst_10 = arith.constant dense<0.000000e+00> : vector<128x128xf32>
    %30 = tpu.matmul %28, %29, %cst_10 {dimension_numbers = #tpu.dot_dimension_numbers<[1], [0], [0], [1], [0, 0, 1, 1], [], []>} : vector<128x128xf32>, vector<128x128xf32>, vector<128x128xf32> -> vector<128x128xf32>
    %c0_11 = arith.constant 0 : index
    %c0_12 = arith.constant 0 : index
    %31 = vector.load %arg6[%c0_11, %c0_12] : memref<1x128xf32, #tpu.memory_space<vmem>>, vector<1x128xf32>
    %32 = vector.broadcast %31 : vector<1x128xf32> to vector<128x128xf32>
    %33 = arith.addf %30, %32 : vector<128x128xf32>
    %cst_13 = arith.constant 0.000000e+00 : f32
    %34 = vector.broadcast %cst_13 : f32 to vector<128x128xf32>
    %35 = arith.maximumf %33, %34 : vector<128x128xf32>
    %c0_14 = arith.constant 0 : index
    %c0_15 = arith.constant 0 : index
    %36 = vector.load %arg7[%c0_14, %c0_15] : memref<128x4xf32, #tpu.memory_space<vmem>>, vector<128x4xf32>
    %cst_16 = arith.constant dense<0.000000e+00> : vector<128x4xf32>
    %37 = tpu.matmul %35, %36, %cst_16 {dimension_numbers = #tpu.dot_dimension_numbers<[1], [0], [0], [1], [0, 0, 1, 1], [], []>} : vector<128x128xf32>, vector<128x4xf32>, vector<128x4xf32> -> vector<128x4xf32>
    %c0_17 = arith.constant 0 : index
    %c0_18 = arith.constant 0 : index
    %38 = vector.load %arg8[%c0_17, %c0_18] : memref<1x4xf32, #tpu.memory_space<vmem>>, vector<1x4xf32>
    %39 = vector.broadcast %38 : vector<1x4xf32> to vector<128x4xf32>
    %40 = arith.addf %37, %39 : vector<128x4xf32>
    %41 = vector.extract_strided_slice %0 {offsets = [0, 0], sizes = [128, 1], strides = [1, 1]} : vector<128x4xf32> to vector<128x1xf32>
    %c0_19 = arith.constant 0 : index
    %c0_20 = arith.constant 0 : index
    %42 = vector.load %arg2[%c0_19, %c0_20] : memref<4x4xf32, #tpu.memory_space<vmem>>, vector<1x4xf32>
    %43 = vector.broadcast %41 : vector<128x1xf32> to vector<128x4xf32>
    %44 = vector.broadcast %42 : vector<1x4xf32> to vector<128x4xf32>
    %45 = arith.mulf %43, %44 : vector<128x4xf32>
    %46 = vector.extract_strided_slice %0 {offsets = [0, 1], sizes = [128, 1], strides = [1, 1]} : vector<128x4xf32> to vector<128x1xf32>
    %c1_21 = arith.constant 1 : index
    %c0_22 = arith.constant 0 : index
    %47 = vector.load %arg2[%c1_21, %c0_22] : memref<4x4xf32, #tpu.memory_space<vmem>>, vector<1x4xf32>
    %48 = vector.broadcast %46 : vector<128x1xf32> to vector<128x4xf32>
    %49 = vector.broadcast %47 : vector<1x4xf32> to vector<128x4xf32>
    %50 = arith.mulf %48, %49 : vector<128x4xf32>
    %51 = arith.addf %45, %50 : vector<128x4xf32>
    %52 = vector.extract_strided_slice %0 {offsets = [0, 2], sizes = [128, 1], strides = [1, 1]} : vector<128x4xf32> to vector<128x1xf32>
    %c2_23 = arith.constant 2 : index
    %c0_24 = arith.constant 0 : index
    %53 = vector.load %arg2[%c2_23, %c0_24] : memref<4x4xf32, #tpu.memory_space<vmem>>, vector<1x4xf32>
    %54 = vector.broadcast %52 : vector<128x1xf32> to vector<128x4xf32>
    %55 = vector.broadcast %53 : vector<1x4xf32> to vector<128x4xf32>
    %56 = arith.mulf %54, %55 : vector<128x4xf32>
    %57 = arith.addf %51, %56 : vector<128x4xf32>
    %58 = vector.extract_strided_slice %0 {offsets = [0, 3], sizes = [128, 1], strides = [1, 1]} : vector<128x4xf32> to vector<128x1xf32>
    %c3_25 = arith.constant 3 : index
    %c0_26 = arith.constant 0 : index
    %59 = vector.load %arg2[%c3_25, %c0_26] : memref<4x4xf32, #tpu.memory_space<vmem>>, vector<1x4xf32>
    %60 = vector.broadcast %58 : vector<128x1xf32> to vector<128x4xf32>
    %61 = vector.broadcast %59 : vector<1x4xf32> to vector<128x4xf32>
    %62 = arith.mulf %60, %61 : vector<128x4xf32>
    %63 = arith.addf %57, %62 : vector<128x4xf32>
    %64 = arith.addf %40, %63 : vector<128x4xf32>
    %c0_27 = arith.constant 0 : index
    %c0_28 = arith.constant 0 : index
    %65 = vector.load %arg9[%c0_27, %c0_28] : memref<128x4xf32, #tpu.memory_space<vmem>>, vector<128x4xf32>
    tpu.vector_store %arg9[%c0_27, %c0_28], %64 {strides = array<i32>} : memref<128x4xf32, #tpu.memory_space<vmem>>, vector<128x4xf32>,
    return
  }
  func.func @transform_0(%arg0: i32) -> (i32, i32) {
    %c0_i32 = arith.constant 0 : i32
    %c0_i32_0 = arith.constant 0 : i32
    return %arg0, %c0_i32 : i32, i32
  }
  func.func @transform_1(%arg0: i32) -> (i32, i32) {
    %c0_i32 = arith.constant 0 : i32
    %c0_i32_0 = arith.constant 0 : i32
    %c0_i32_1 = arith.constant 0 : i32
    return %c0_i32, %c0_i32_0 : i32, i32
  }
  func.func @transform_2(%arg0: i32) -> (i32, i32) {
    %c0_i32 = arith.constant 0 : i32
    %c0_i32_0 = arith.constant 0 : i32
    %c0_i32_1 = arith.constant 0 : i32
    return %c0_i32, %c0_i32_0 : i32, i32
  }
  func.func @transform_3(%arg0: i32) -> (i32, i32) {
    %c0_i32 = arith.constant 0 : i32
    %c0_i32_0 = arith.constant 0 : i32
    %c0_i32_1 = arith.constant 0 : i32
    return %c0_i32, %c0_i32_0 : i32, i32
  }
  func.func @transform_4(%arg0: i32) -> (i32, i32) {
    %c0_i32 = arith.constant 0 : i32
    %c0_i32_0 = arith.constant 0 : i32
    %c0_i32_1 = arith.constant 0 : i32
    return %c0_i32, %c0_i32_0 : i32, i32
  }
  func.func @transform_5(%arg0: i32) -> (i32, i32) {
    %c0_i32 = arith.constant 0 : i32
    %c0_i32_0 = arith.constant 0 : i32
    %c0_i32_1 = arith.constant 0 : i32
    return %c0_i32, %c0_i32_0 : i32, i32
  }
  func.func @transform_6(%arg0: i32) -> (i32, i32) {
    %c0_i32 = arith.constant 0 : i32
    %c0_i32_0 = arith.constant 0 : i32
    %c0_i32_1 = arith.constant 0 : i32
    return %c0_i32, %c0_i32_0 : i32, i32
  }
  func.func @transform_7(%arg0: i32) -> (i32, i32) {
    %c0_i32 = arith.constant 0 : i32
    %c0_i32_0 = arith.constant 0 : i32
    %c0_i32_1 = arith.constant 0 : i32
    return %c0_i32, %c0_i32_0 : i32, i32
  }
  func.func @transform_8(%arg0: i32) -> (i32, i32) {
    %c0_i32 = arith.constant 0 : i32
    %c0_i32_0 = arith.constant 0 : i32
    return %arg0, %c0_i32 : i32, i32
  }
}

</mosaic_0001>

<bundles_post_ra>
// kernel: tpu_custom_call.1
= control target key start
LH: loop header
LB: loop body
LE: loop exit
PB: predicated region body
PF: predicated region fallthrough
CT: control target
= control target key end

     0   :  { %s1326_s27 = smov 0   ;;  %s1916_s0 = inlined_call_operand.vmem [shape: f32[256,4], index: 0, kind: input, shape index: {}]   ;;  %s1917_s1 = inlined_call_operand.vmem [shape: f32[4,4], index: 1, kind: input, shape index: {}]   ;;  %s1918_s2 = inlined_call_operand.vmem [shape: f32[4,128], index: 2, kind: input, shape index: {}]   ;;  %s1919_s3 = inlined_call_operand.vmem [shape: f32[1,128], index: 3, kind: input, shape index: {}]   ;;  %s1920_s4 = inlined_call_operand.vmem [shape: f32[128,128], index: 4, kind: input, shape index: {}]   ;;  %s1921_s5 = inlined_call_operand.vmem [shape: f32[1,128], index: 5, kind: input, shape index: {}]   ;;  %s1922_s6 = inlined_call_operand.vmem [shape: f32[128,4], index: 6, kind: input, shape index: {}]   ;;  %s1923_s7 = inlined_call_operand.vmem [shape: f32[1,4], index: 7, kind: input, shape index: {}]   ;;  %s1924_s8 = inlined_call_operand.vmem [shape: f32[256,4], index: 8, kind: output, shape index: {}]  }
   0x1 LB: > { %s1148_s28 = sadd.s32 4294967295, %s1275_s27   ;;  %p1152_p0 = scmp.ge.s32.totalorder %s1275_s27, 1  ;;  %s1275_s27 = sphi %s1326_s27, %s18_s27  }
   0x2   : > { %p263_p1 = scmp.lt.s32.totalorder %s1275_s27, 3 }
   0x4   : > { %p264_p2 = pnand %p1152_p0, %p263_p1 }
   0x5   : > { %s1153_s29 = sshll.u32 (!%p264_p2), %s1148_s28, 4 }
   0x6   : > { %267 = sbr.rel (%p264_p2) target bundleno = 614 (0x266), region = 52  ;;  %p298_p3 = scmp.lt.s32.totalorder (!%p264_p2), %s1153_s29, 31 }
   0xb   : > { %v1277_v0 = vmov 3   ;;  %v1278_v1 = vmov 1   ;;  %v1279_v2 = vmov 0   ;;  %s1926_s29 = smov (!%p298_p3, %s1153_s29), 31  ;;  %v1280_v6 = vmov 2   ;;  %v768_v12 = vld [vmem:[%s1920_s4 + $0x78] sm:$0xff] }
   0xc   : > { %1206 = vset.pattern.permute.xlu2 %v1277_v0  ;;  %1204 = vset.pattern.permute.xlu1 %v1278_v1  ;;  %s1154_s30 = sshll.u32 %s1926_s29, 3  ;;  %v767_v14 = vld [vmem:[%s1920_s4 + $0x70] sm:$0xff]  ;;  %v766_v15 = vld [vmem:[%s1920_s4 + $0x68] sm:$0xff]  ;;  %v765_v16 = vld [vmem:[%s1920_s4 + $0x60] sm:$0xff]  ;;  %vm1075_vm0 = vcmask 31744  }
   0xd   : > { %1203 = vset.pattern.permute.xlu0 %v1279_v2  ;;  %s1345_s11 = scalar_lea.vmem %s1916_s0, %s1154_s30  ;;  %1159 = vmatpush.msra.mxu2 %v768_v12  ;;  %v764_v17 = vld [vmem:[%s1920_s4 + $0x58] sm:$0xff]  ;;  %v763_v18 = vld [vmem:[%s1920_s4 + $0x50] sm:$0xff]  ;;  %v762_v19 = vld [vmem:[%s1920_s4 + $0x48] sm:$0xff] }
   0xe   : > { %v317_v3 = vld [vmem:[%s1345_s11 + $0x40] sm:$0xff]  ;;  %v318_v5 = vld [vmem:[%s1345_s11 + $0x48] sm:$0xff]  ;;  %v319_v8 = vld [vmem:[%s1345_s11 + $0x50] sm:$0xff]  ;;  %773 = vmatpush.msra.mxu0 %v768_v12 }
   0xf   : > { %673 = vperm.xlu2 %1206, %v317_v3   ;;  %477 = vperm.xlu1 %1204, %v317_v3   ;;  %v309_v4 = vld [vmem:[%s1345_s11] sm:$0xff]  ;;  %v310_v9 = vld [vmem:[%s1345_s11 + $0x8] sm:$0xff]  ;;  %v320_v11 = vld [vmem:[%s1345_s11 + $0x58] sm:$0xff] }
  0x10   : > { %369 = vperm.xlu0 %1203, %v317_v3   ;;  %v1355_v7 = vld [vmem:[%s1345_s11 + $0x60] sm:$0xff]  ;;  %v1368_v10 = vld [vmem:[%s1345_s11 + $0x68] sm:$0xff]  ;;  %v311_v13 = vld [vmem:[%s1345_s11 + $0x10] sm:$0xff]  ;;  %1160 = vmatpush.msra.mxu2 %v767_v14 }
  0x11   : > { %774 = vmatpush.msra.mxu0 %v767_v14  ;;  %v761_v20 = vld [vmem:[%s1920_s4 + $0x40] sm:$0xff]  ;;  %v760_v21 = vld [vmem:[%s1920_s4 + $0x38] sm:$0xff]  ;;  %v759_v22 = vld [vmem:[%s1920_s4 + $0x30] sm:$0xff] }
  0x12   : > { %1161 = vmatpush.msra.mxu2 %v766_v15  ;;  %v758_v23 = vld [vmem:[%s1920_s4 + $0x28] sm:$0xff]  ;;  %v757_v25 = vld [vmem:[%s1920_s4 + $0x20] sm:$0xff]  ;;  %v756_v26 = vld [vmem:[%s1920_s4 + $0x18] sm:$0xff] }
  0x13   : > { %775 = vmatpush.msra.mxu0 %v766_v15  ;;  %v755_v27 = vld [vmem:[%s1920_s4 + $0x10] sm:$0xff]  ;;  %v312_v28 = vld [vmem:[%s1345_s11 + $0x18] sm:$0xff]  ;;  %v754_v29 = vld [vmem:[%s1920_s4 + $0x8] sm:$0xff] }
  0x14   : > { %1162 = vmatpush.msra.mxu2 %v765_v16  ;;  %v753_v31 = vld [vmem:[%s1920_s4] sm:$0xff]  ;;  %v1462_v36 = vld [vmem:[%s1345_s11 + $0x28] sm:$0xff] }
  0x15   : > { %776 = vmatpush.msra.mxu0 %v765_v16  ;;  %v1449_v33 = vld [vmem:[%s1917_s1 + $0x1] ss:$0 sm:$0xff]  ;;  %v1454_v34 = vld [vmem:[%s1917_s1] ss:$0 sm:$0xff]  ;;  %v1487_v47 = vld [vmem:[%s1918_s2 + $0x2] ss:$0 sm:$0xff] }
  0x16   : > { %1163 = vmatpush.msra.mxu2 %v764_v17  ;;  %v1459_v35 = vld [vmem:[%s1918_s2] ss:$0 sm:$0xff]  ;;  %v1481_v45 = vld [vmem:[%s1918_s2 + $0x1] ss:$0 sm:$0xff]  ;;  %v1492_v48 = vld [vmem:[%s1917_s1 + $0x2] ss:$0 sm:$0xff] }
  0x17   : > { %1207 = vset.pattern.permute.xlu2 %v1279_v2  ;;  %1205 = vset.pattern.permute.xlu1 %v1280_v6  ;;  %v1471_v41 = vld [vmem:[%s1919_s3] ss:$0 sm:$0xff]  ;;  %v1497_v49 = vld [vmem:[%s1918_s2 + $0x3] ss:$0 sm:$0xff] }
  0x18   : > { %329 = vperm.xlu0 %1203, %v309_v4   ;;  %374 = vperm.xlu2 %1207, %v318_v5   ;;  %v1502_v50 = vld [vmem:[%s1917_s1 + $0x3] ss:$0 sm:$0xff] }
  0x19   : > { %575 = vperm.xlu1 %1205, %v317_v3   ;;  %1164 = vmatpush.msra.mxu2 %v763_v18  ;;  %v1511_v57 = vld [vmem:[%s1345_s11 + $0x20] sm:$0xff] }
  0x1a   : > { %777 = vmatpush.msra.mxu0 %v764_v17 }
  0x1b   : > { %1165 = vmatpush.msra.mxu2 %v762_v19 }
  0x1c   : > { %778 = vmatpush.msra.mxu0 %v763_v18 }
  0x1d   : > { %1166 = vmatpush.msra.mxu2 %v761_v20 }
  0x1e   : > { %779 = vmatpush.msra.mxu0 %v762_v19 }
  0x1f   : > { %1167 = vmatpush.msra.mxu2 %v760_v21 }
  0x20   : > { %1211 = vset.pattern.permute.xlu0 %v1280_v6  ;;  %1208 = vset.pattern.permute.xlu2 %v1278_v1 }
  0x21   : > { %579 = vperm.xlu1 %1205, %v318_v5   ;;  %543 = vperm.xlu0 %1211, %v309_v4  }
  0x22   : > { %445 = vperm.xlu2 %1208, %v309_v4   ;;  %1168 = vmatpush.msra.mxu2 %v759_v22 }
  0x23   : > { %780 = vmatpush.msra.mxu0 %v761_v20 }
  0x24   : > { %1169 = vmatpush.msra.mxu2 %v758_v23 }
  0x25   : > { %781 = vmatpush.msra.mxu0 %v760_v21 }
  0x26   : > { %1170 = vmatpush.msra.mxu2 %v757_v25 }
  0x27   : > { %782 = vmatpush.msra.mxu0 %v759_v22 }
  0x28   : > { %1171 = vmatpush.msra.mxu2 %v756_v26 }
  0x29   : > { %1209 = vset.pattern.permute.xlu1 %v1277_v0  ;;  %591 = vperm.xlu0 %1211, %v1355_v7  }
  0x2a   : > { %677 = vperm.xlu1 %1209, %v318_v5   ;;  %1210 = vset.pattern.permute.xlu2 %v1279_v2 }
  0x2b   : > { %379 = vperm.xlu2 %1210, %v319_v8   ;;  %783 = vmatpush.msra.mxu0 %v758_v23 }
  0x2c   : > { %1172 = vmatpush.msra.mxu2 %v755_v27 }
  0x2d   : > { %784 = vmatpush.msra.mxu0 %v757_v25 }
  0x2e   : > { %1173 = vmatpush.msra.mxu2 %v754_v29 }
  0x2f   : > { %785 = vmatpush.msra.mxu0 %v756_v26 }
  0x30   : > { %1174 = vmatpush.msra.mxu2 %v753_v31 }
  0x31   : > { %1228 = vset.pattern.permute.xlu0 %v1278_v1  ;;  %786 = vmatpush.msra.mxu0 %v755_v27 }
  0x32   : > { %1212 = vset.pattern.permute.xlu1 %v1278_v1  ;;  %481 = vperm.xlu0 %1228, %v318_v5  }
  0x33   : > { %485 = vperm.xlu1 %1212, %v319_v8   ;;  %1213 = vset.pattern.permute.xlu2 %v1277_v0 }
  0x34   : > { %641 = vperm.xlu2 %1213, %v309_v4   ;;  %787 = vmatpush.msra.mxu0 %v754_v29 }
  0x36   : > { %788 = vmatpush.msra.mxu0 %v753_v31 }
  0x3a   : > { %449 = vperm.xlu0 %1228, %v310_v9  }
  0x3b   : > { %1214 = vset.pattern.permute.xlu1 %v1279_v2 }
  0x3c   : > { %334 = vperm.xlu1 %1214, %v310_v9   ;;  %1215 = vset.pattern.permute.xlu2 %v1280_v6 }
  0x3d   : > { %583 = vperm.xlu2 %1215, %v319_v8  }
  0x42   : > { %497 = vperm.xlu0 %1228, %v1368_v10  }
  0x44   : > { %1216 = vset.pattern.permute.xlu1 %v1277_v0 }
  0x45   : > { %681 = vperm.xlu1 %1216, %v319_v8   ;;  %1217 = vset.pattern.permute.xlu2 %v1279_v2 }
  0x46   : > { %384 = vperm.xlu2 %1217, %v320_v11  }
  0x4a   : > { %1233 = vset.pattern.permute.xlu0 %v1277_v0 }
  0x4b   : > { %645 = vperm.xlu0 %1233, %v310_v9  }
  0x4d   : > { %1218 = vset.pattern.permute.xlu1 %v1280_v6 }
  0x4e   : > { %547 = vperm.xlu1 %1218, %v310_v9   ;;  %1219 = vset.pattern.permute.xlu2 %v1278_v1 }
  0x4f   : > { %489 = vperm.xlu2 %1219, %v320_v11  }
  0x53   : > { %693 = vperm.xlu0 %1233, %v1368_v10  }
  0x56   : > { %1220 = vset.pattern.permute.xlu1 %v1279_v2 }
  0x57   : > { %339 = vperm.xlu1 %1220, %v311_v13   ;;  %1221 = vset.pattern.permute.xlu2 %v1280_v6 }
  0x58   : > { %587 = vperm.xlu2 %1221, %v320_v11  }
  0x5b   : > { %1238 = vset.pattern.permute.xlu0 %v1279_v2 }
  0x5c   : > { %389 = vperm.xlu0 %1238, %v1355_v7  }
  0x5f   : > { %1222 = vset.pattern.permute.xlu1 %v1278_v1 }
  0x60   : > { %453 = vperm.xlu1 %1222, %v311_v13   ;;  %1223 = vset.pattern.permute.xlu2 %v1277_v0 }
  0x61   : > { %685 = vperm.xlu2 %1223, %v320_v11  }
  0x64   : > { %354 = vperm.xlu0 %1238, %v1462_v36  }
  0x68   : > { %1224 = vset.pattern.permute.xlu1 %v1280_v6 }
  0x69   : > { %551 = vperm.xlu1 %1224, %v311_v13   ;;  %1225 = vset.pattern.permute.xlu2 %v1278_v1  ;;  %v1420_v24 = vpop.permute.xlu2 %673 }
  0x6a   : > { %493 = vperm.xlu2 %1225, %v1355_v7   ;;  %v713_v61 = vmul.f32 %v1497_v49, %v1420_v24  ;;  %v1035_v62 = vmul.f32 %v1502_v50, %v1420_v24 }
  0x6c   : > { %1247 = vset.pattern.permute.xlu0 %v1280_v6 }
  0x6d   : > { %563 = vperm.xlu0 %1247, %v1462_v36  }
  0x71   : > { %1226 = vset.pattern.permute.xlu1 %v1277_v0 }
  0x72   : > { %649 = vperm.xlu1 %1226, %v311_v13   ;;  %1227 = vset.pattern.permute.xlu2 %v1279_v2  ;;  %v1438_v30 = vpop.permute.xlu2 %374 }
  0x73   : > { %344 = vperm.xlu2 %1227, %v312_v28   ;;  %v417_v29 = vmul.f32 %v1459_v35, %v1438_v30 }
  0x75   : > { %1252 = vset.pattern.permute.xlu0 %v1278_v1 }
  0x7a   : > { %1229 = vset.pattern.permute.xlu1 %v1278_v1 }
  0x7b   : > { %457 = vperm.xlu1 %1229, %v312_v28   ;;  %1230 = vset.pattern.permute.xlu2 %v1277_v0 }
  0x7c   : > { %689 = vperm.xlu2 %1230, %v1355_v7   ;;  %v446_v32 = vpop.permute.xlu2 %445 }
  0x7d   : > { %v959_v51 = vmul.f32 %v1449_v33, %v446_v32  ;;  %v509_v3 = vmul.f32 %v1481_v45, %v446_v32  ;;  %v436_v32 = vadd.f32 %v1471_v41, %v417_v29 }
  0x81   : > { %v478_v37 = vpop.permute.xlu1 %477 }
  0x82   : > { %v967_v38 = vmul.f32 %v1449_v33, %v478_v37  ;;  %v370_v39 = vpop.permute.xlu0 %369  ;;  %v517_v52 = vmul.f32 %v1481_v45, %v478_v37  ;;  %v950_v37 = vmul.f32 %v1454_v34, %v1438_v30 }
  0x83   : > { %v949_v40 = vmul.f32 %v1454_v34, %v370_v39  ;;  %1231 = vset.pattern.permute.xlu1 %v1279_v2  ;;  %v416_v42 = vmul.f32 %v1459_v35, %v370_v39 }
  0x84   : > { %394 = vperm.xlu1 %1231, %v1368_v10   ;;  %1232 = vset.pattern.permute.xlu2 %v1280_v6 }
  0x85   : > { %v983_v43 = vadd.f32 %v967_v38, %v949_v40  ;;  %555 = vperm.xlu2 %1232, %v312_v28   ;;  %v1476_v44 = vpop.permute.xlu2 %379  ;;  %v435_v46 = vadd.f32 %v1471_v41, %v416_v42 }
  0x86   : > { %v951_v42 = vmul.f32 %v1454_v34, %v1476_v44 }
  0x87   : > { %v533_v58 = vadd.f32 %v517_v52, %v435_v46 }
  0x8a   : > { %v330_v53 = vpop.permute.xlu0 %329 }
  0x8b   : > { %v576_v54 = vpop.permute.xlu1 %575  ;;  %v408_v55 = vmul.f32 %v1459_v35, %v330_v53  ;;  %v941_v56 = vmul.f32 %v1454_v34, %v330_v53 }
  0x8c   : > { %v615_v59 = vmul.f32 %v1487_v47, %v576_v54  ;;  %v1001_v60 = vmul.f32 %v1492_v48, %v576_v54  ;;  %1234 = vset.pattern.permute.xlu1 %v1277_v0 }
  0x8d   : > { %v975_v63 = vadd.f32 %v959_v51, %v941_v56  ;;  %653 = vperm.xlu1 %1234, %v312_v28   ;;  %1235 = vset.pattern.permute.xlu2 %v1279_v2  ;;  %v427_v7 = vadd.f32 %v1471_v41, %v408_v55  ;;  %v1542_v28 = vld [vmem:[%s1345_s11 + $0x70] sm:$0xff] }
  0x8e   : > { %v631_v4 = vadd.f32 %v615_v59, %v533_v58  ;;  %v1017_v5 = vadd.f32 %v1001_v60, %v983_v43  ;;  %349 = vperm.xlu2 %1235, %v1511_v57   ;;  %v642_v8 = vpop.permute.xlu2 %641 }
  0x8f   : > { %v525_v12 = vadd.f32 %v509_v3, %v427_v7  ;;  %v705_v18 = vmul.f32 %v1497_v49, %v642_v8  ;;  %v1027_v19 = vmul.f32 %v1502_v50, %v642_v8 }
  0x90   : > { %v729_v9 = vadd.f32 %v713_v61, %v631_v4  ;;  %v1524_v11 = vadd.f32 %v1035_v62, %v1017_v5  ;;  %v1571_v4 = vld [vmem:[%s1345_s11 + $0x30] sm:$0xff] }
  0x91   : > { %469 = vperm.xlu0 %1252, %v1571_v4  }
  0x92   : > { %v745_v13 = vmax.f32 %v729_v9, 0.0 }
  0x93   : > { %v580_v14 = vpop.permute.xlu1 %579  ;;  %v544_v15 = vpop.permute.xlu0 %543 }
  0x94   : > { %v607_v16 = vmul.f32 %v1487_v47, %v544_v15  ;;  %v993_v17 = vmul.f32 %v1492_v48, %v544_v15  ;;  %813 = vmatmul.f32.vlgmr.msra.gmra.mxu2 %v745_v13  ;;  %v616_v51 = vmul.f32 %v1487_v47, %v580_v14  ;;  %v1002_v52 = vmul.f32 %v1492_v48, %v580_v14 }
  0x95   : > { %1236 = vset.pattern.permute.xlu1 %v1280_v6 }
  0x96   : > { %v623_v20 = vadd.f32 %v607_v16, %v525_v12  ;;  %v1009_v21 = vadd.f32 %v993_v17, %v975_v63  ;;  %595 = vperm.xlu1 %1236, %v1368_v10   ;;  %1237 = vset.pattern.permute.xlu2 %v1278_v1 }
  0x97   : > { %461 = vperm.xlu2 %1237, %v1511_v57   ;;  %v1535_v22 = vpop.permute.xlu2 %583 }
  0x98   : > { %v1537_v23 = vadd.f32 %v1027_v19, %v1009_v21  ;;  %v721_v24 = vadd.f32 %v705_v18, %v623_v20  ;;  %v1003_v43 = vmul.f32 %v1492_v48, %v1535_v22 }
  0x9a   : > { %v737_v25 = vmax.f32 %v721_v24, 0.0  ;;  %v617_v24 = vmul.f32 %v1487_v47, %v1535_v22 }
  0x9b   : > { %v1539_v26 = vpop.permute.xlu0 %591 }
  0x9c   : > { %v678_v27 = vpop.permute.xlu1 %677  ;;  %789 = vmatmul.f32.vlgmr.msra.gmra.mxu0 %v737_v25 }
  0x9d   : > { %v714_v56 = vmul.f32 %v1497_v49, %v678_v27  ;;  %v1036_v58 = vmul.f32 %v1502_v50, %v678_v27 }
  0x9e   : > { %1239 = vset.pattern.permute.xlu1 %v1279_v2 }
  0x9f   : > { %399 = vperm.xlu1 %1239, %v1542_v28   ;;  %1240 = vset.pattern.permute.xlu2 %v1280_v6 }
  0xa0   : > { %559 = vperm.xlu2 %1240, %v1511_v57   ;;  %v385_v10 = vpop.permute.xlu2 %384 }
  0xa1   : > { %v952_v55 = vmul.f32 %v1454_v34, %v385_v10  ;;  %v419_v13 = vmul.f32 %v1459_v35, %v385_v10 }
  0xa4   : > { %v482_v31 = vpop.permute.xlu0 %481 }
  0xa5   : > { %v518_v38 = vmul.f32 %v1481_v45, %v482_v31  ;;  %v968_v39 = vmul.f32 %v1449_v33, %v482_v31  ;;  %v486_v40 = vpop.permute.xlu1 %485 }
  0xa6   : > { %v969_v46 = vmul.f32 %v1449_v33, %v486_v40  ;;  %v519_v16 = vmul.f32 %v1481_v45, %v486_v40  ;;  %v1599_v40 = vld [vmem:[%s1345_s11 + $0x78] sm:$0xff] }
  0xa7   : > { %v534_v53 = vadd.f32 %v518_v38, %v436_v32  ;;  %v984_v30 = vadd.f32 %v968_v39, %v950_v37  ;;  %1241 = vset.pattern.permute.xlu1 %v1278_v1 }
  0xa8   : > { %v985_v54 = vadd.f32 %v969_v46, %v951_v42  ;;  %501 = vperm.xlu1 %1241, %v1542_v28   ;;  %1242 = vset.pattern.permute.xlu2 %v1277_v0 }
  0xa9   : > { %v1018_v59 = vadd.f32 %v1002_v52, %v984_v30  ;;  %657 = vperm.xlu2 %1242, %v1511_v57   ;;  %v490_v60 = vpop.permute.xlu2 %489  ;;  %v632_v61 = vadd.f32 %v616_v51, %v534_v53  ;;  %v418_v57 = vmul.f32 %v1459_v35, %v1476_v44  ;;  %v438_v44 = vadd.f32 %v1471_v41, %v419_v13  ;;  %v1609_v53 = vld [vmem:[%s1345_s11 + $0x38] sm:$0xff]  ;;  %s1843_s11 = scalar_lea.vmem %s1924_s8, %s1154_s30 }
  0xaa   : > { %v970_v62 = vmul.f32 %v1449_v33, %v490_v60  ;;  %v1019_v63 = vadd.f32 %v1003_v43, %v985_v54  ;;  %v520_v19 = vmul.f32 %v1481_v45, %v490_v60  ;;  %473 = vperm.xlu0 %1252, %v1609_v53  }
  0xab   : > { %v730_v3 = vadd.f32 %v714_v56, %v632_v61  ;;  %v1573_v5 = vadd.f32 %v1036_v58, %v1018_v59  ;;  %v437_v18 = vadd.f32 %v1471_v41, %v418_v57 }
  0xac   : > { %v986_v7 = vadd.f32 %v970_v62, %v952_v55  ;;  %v450_v8 = vpop.permute.xlu0 %449  ;;  %v536_v29 = vadd.f32 %v520_v19, %v438_v44  ;;  %v1005_v44 = vmul.f32 %v1492_v48, %v1539_v26 }
  0xad   : > { %v960_v9 = vmul.f32 %v1449_v33, %v450_v8  ;;  %v746_v12 = vmax.f32 %v730_v3, 0.0  ;;  %v535_v25 = vadd.f32 %v519_v16, %v437_v18  ;;  %v510_v51 = vmul.f32 %v1481_v45, %v450_v8 }
  0xae   : > { %v335_v14 = vpop.permute.xlu1 %334 }
  0xaf   : > { %v942_v15 = vmul.f32 %v1454_v34, %v335_v14  ;;  %816 = vmatmul.f32.gmra.mxu2 %v746_v12  ;;  %v409_v37 = vmul.f32 %v1459_v35, %v335_v14  ;;  %v633_v42 = vadd.f32 %v617_v24, %v535_v25  ;;  %v619_v24 = vmul.f32 %v1487_v47, %v1539_v26 }
  0xb0   : > { %1243 = vset.pattern.permute.xlu1 %v1280_v6 }
  0xb1   : > { %v976_v17 = vadd.f32 %v960_v9, %v942_v15  ;;  %599 = vperm.xlu1 %1243, %v1542_v28   ;;  %1244 = vset.pattern.permute.xlu2 %v1278_v1  ;;  %v428_v30 = vadd.f32 %v1471_v41, %v409_v37 }
  0xb2   : > { %465 = vperm.xlu2 %1244, %v1462_v36   ;;  %v588_v20 = vpop.permute.xlu2 %587  ;;  %1257 = vset.pattern.permute.xlu0 %v1277_v0 }
  0xb3   : > { %v1004_v21 = vmul.f32 %v1492_v48, %v588_v20  ;;  %v618_v31 = vmul.f32 %v1487_v47, %v588_v20  ;;  %v526_v60 = vadd.f32 %v510_v51, %v428_v30  ;;  %v869_v30 = vld [vmem:[%s1922_s6 + $0x78] sm:$0xff] }
  0xb4   : > { %v1592_v27 = vpop.permute.xlu0 %497  ;;  %1175 = vmatpush.msra.mxu3 %v869_v30  ;;  %874 = vmatpush.msra.mxu1 %v869_v30  ;;  %v856_v30 = vld [vmem:[%s1922_s6 + $0x10] sm:$0xff] }
  0xb5   : > { %v1020_v10 = vadd.f32 %v1004_v21, %v986_v7  ;;  %v634_v22 = vadd.f32 %v618_v31, %v536_v29 }
  0xb7   : > { %v682_v32 = vpop.permute.xlu1 %681 }
  0xb8   : > { %v715_v38 = vmul.f32 %v1497_v49, %v682_v32  ;;  %v1037_v39 = vmul.f32 %v1502_v50, %v682_v32 }
  0xb9   : > { %1245 = vset.pattern.permute.xlu1 %v1277_v0 }
  0xba   : > { %v1602_v43 = vadd.f32 %v1037_v39, %v1019_v63  ;;  %697 = vperm.xlu1 %1245, %v1542_v28   ;;  %1246 = vset.pattern.permute.xlu2 %v1279_v2  ;;  %v731_v46 = vadd.f32 %v715_v38, %v633_v42 }
  0xbb   : > { %404 = vperm.xlu2 %1246, %v1599_v40   ;;  %v686_v52 = vpop.permute.xlu2 %685 }
  0xbc   : > { %v716_v54 = vmul.f32 %v1497_v49, %v686_v52  ;;  %v1038_v55 = vmul.f32 %v1502_v50, %v686_v52  ;;  %v747_v56 = vmax.f32 %v731_v46, 0.0 }
  0xbd   : > { %v646_v28 = vpop.permute.xlu0 %645 }
  0xbe   : > { %v1615_v58 = vadd.f32 %v1038_v55, %v1020_v10  ;;  %819 = vmatmul.f32.gmra.mxu2 %v747_v56  ;;  %v732_v59 = vadd.f32 %v716_v54, %v634_v22  ;;  %v706_v3 = vmul.f32 %v1497_v49, %v646_v28  ;;  %v1028_v7 = vmul.f32 %v1502_v50, %v646_v28  ;;  %v868_v28 = vld [vmem:[%s1922_s6 + $0x70] sm:$0xff] }
  0xbf   : > { %1176 = vmatpush.msra.mxu3 %v868_v28  ;;  %875 = vmatpush.msra.mxu1 %v868_v28 }
  0xc0   : > { %v548_v61 = vpop.permute.xlu1 %547  ;;  %v748_v8 = vmax.f32 %v732_v59, 0.0 }
  0xc1   : > { %v608_v62 = vmul.f32 %v1487_v47, %v548_v61  ;;  %v994_v63 = vmul.f32 %v1492_v48, %v548_v61 }
  0xc2   : > { %1248 = vset.pattern.permute.xlu1 %v1278_v1 }
  0xc3   : > { %v624_v9 = vadd.f32 %v608_v62, %v526_v60  ;;  %v1010_v12 = vadd.f32 %v994_v63, %v976_v17  ;;  %505 = vperm.xlu1 %1248, %v1599_v40   ;;  %1249 = vset.pattern.permute.xlu2 %v1277_v0 }
  0xc4   : > { %661 = vperm.xlu2 %1249, %v1462_v36   ;;  %v494_v57 = vpop.permute.xlu2 %493 }
  0xc5   : > { %v1626_v13 = vadd.f32 %v1028_v7, %v1010_v12  ;;  %v1628_v14 = vpop.permute.xlu0 %693  ;;  %v722_v15 = vadd.f32 %v706_v3, %v624_v9  ;;  %v971_v36 = vmul.f32 %v1449_v33, %v494_v57  ;;  %v521_v19 = vmul.f32 %v1481_v45, %v494_v57  ;;  %v865_v3 = vld [vmem:[%s1922_s6 + $0x58] sm:$0xff] }
  0xc6   : > { %822 = vmatmul.f32.gmra.mxu2 %v748_v8 }
  0xc7   : > { %v738_v16 = vmax.f32 %v722_v15, 0.0  ;;  %v864_v15 = vld [vmem:[%s1922_s6 + $0x50] sm:$0xff] }
  0xc9   : > { %v340_v1 = vpop.permute.xlu1 %339  ;;  %792 = vmatmul.f32.gmra.mxu0 %v738_v16 }
  0xca   : > { %v943_v31 = vmul.f32 %v1454_v34, %v340_v1  ;;  %v410_v56 = vmul.f32 %v1459_v35, %v340_v1 }
  0xcb   : > { %1250 = vset.pattern.permute.xlu1 %v1279_v2 }
  0xcc   : > { %359 = vperm.xlu1 %1250, %v1571_v4   ;;  %1251 = vset.pattern.permute.xlu2 %v1280_v6  ;;  %v429_v62 = vadd.f32 %v1471_v41, %v410_v56 }
  0xcd   : > { %v1634_v17 = vpop.permute.xlu2 %344  ;;  %603 = vperm.xlu2 %1251, %v1599_v40  }
  0xce   : > { %v390_v18 = vpop.permute.xlu0 %389 }
  0xcf   : > { %v420_v20 = vmul.f32 %v1459_v35, %v390_v18  ;;  %v953_v21 = vmul.f32 %v1454_v34, %v390_v18 }
  0xd1   : > { %v439_v25 = vadd.f32 %v1471_v41, %v420_v20  ;;  %v987_v10 = vadd.f32 %v971_v36, %v953_v21 }
  0xd2   : > { %v454_v29 = vpop.permute.xlu1 %453 }
  0xd3   : > { %v537_v32 = vadd.f32 %v521_v19, %v439_v25  ;;  %v961_v37 = vmul.f32 %v1449_v33, %v454_v29  ;;  %v1021_v38 = vadd.f32 %v1005_v44, %v987_v10  ;;  %v511_v60 = vmul.f32 %v1481_v45, %v454_v29  ;;  %v862_v44 = vld [vmem:[%s1922_s6 + $0x40] sm:$0xff]  ;;  %v859_v25 = vld [vmem:[%s1922_s6 + $0x28] sm:$0xff] }
  0xd4   : > { %1253 = vset.pattern.permute.xlu1 %v1277_v0  ;;  %v944_v19 = vmul.f32 %v1454_v34, %v1634_v17 }
  0xd5   : > { %v977_v39 = vadd.f32 %v961_v37, %v943_v31  ;;  %701 = vperm.xlu1 %1253, %v1599_v40   ;;  %v635_v42 = vadd.f32 %v619_v24, %v537_v32  ;;  %567 = vperm.xlu2 %1251, %v1571_v4   ;;  %v527_v7 = vadd.f32 %v511_v60, %v429_v62  ;;  %v860_v24 = vld [vmem:[%s1922_s6 + $0x30] sm:$0xff] }
  0xd6   : > { %v690_v22 = vpop.permute.xlu2 %689 }
  0xd7   : > { %v717_v26 = vmul.f32 %v1497_v49, %v690_v22  ;;  %v1039_v46 = vmul.f32 %v1502_v50, %v690_v22  ;;  %v972_v22 = vmul.f32 %v1449_v33, %v1592_v27 }
  0xd9   : > { %v1652_v51 = vadd.f32 %v1039_v46, %v1021_v38  ;;  %v733_v52 = vadd.f32 %v717_v26, %v635_v42  ;;  %v858_v38 = vld [vmem:[%s1922_s6 + $0x20] sm:$0xff]  ;;  %v857_v42 = vld [vmem:[%s1922_s6 + $0x18] sm:$0xff]  ;;  %v411_v26 = vmul.f32 %v1459_v35, %v1634_v17 }
  0xdb   : > { %v552_v54 = vpop.permute.xlu1 %551  ;;  %v749_v55 = vmax.f32 %v733_v52, 0.0  ;;  %v430_v17 = vadd.f32 %v1471_v41, %v411_v26 }
  0xdc   : > { %v995_v40 = vmul.f32 %v1492_v48, %v552_v54  ;;  %v609_v63 = vmul.f32 %v1487_v47, %v552_v54 }
  0xdd   : > { %665 = vperm.xlu1 %1253, %v1571_v4   ;;  %825 = vmatmul.f32.gmra.mxu2 %v749_v55  ;;  %v867_v4 = vld [vmem:[%s1922_s6 + $0x68] sm:$0xff] }
  0xde   : > { %v1011_v59 = vadd.f32 %v995_v40, %v977_v39  ;;  %1254 = vset.pattern.permute.xlu2 %v1279_v2  ;;  %1177 = vmatpush.msra.mxu3 %v867_v4  ;;  %v866_v2 = vld [vmem:[%s1922_s6 + $0x60] sm:$0xff]  ;;  %v625_v9 = vadd.f32 %v609_v63, %v527_v7  ;;  %v855_v40 = vld [vmem:[%s1922_s6 + $0x8] sm:$0xff] }
  0xdf   : > { %v1665_v61 = vpop.permute.xlu2 %555  ;;  %364 = vperm.xlu2 %1254, %v1609_v53   ;;  %876 = vmatpush.msra.mxu1 %v867_v4  ;;  %v854_v4 = vld [vmem:[%s1922_s6] sm:$0xff] }
  0xe0   : > { %1178 = vmatpush.msra.mxu3 %v866_v2  ;;  %v996_v20 = vmul.f32 %v1492_v48, %v1665_v61  ;;  %v610_v63 = vmul.f32 %v1487_v47, %v1665_v61 }
  0xe1   : > { %877 = vmatpush.msra.mxu1 %v866_v2 }
  0xe2   : > { %1179 = vmatpush.msra.mxu3 %v865_v3 }
  0xe3   : > { %878 = vmatpush.msra.mxu1 %v865_v3 }
  0xe4   : > { %v650_v8 = vpop.permute.xlu1 %649  ;;  %1180 = vmatpush.msra.mxu3 %v864_v15 }
  0xe5   : > { %v707_v12 = vmul.f32 %v1497_v49, %v650_v8  ;;  %v1029_v57 = vmul.f32 %v1502_v50, %v650_v8  ;;  %1255 = vset.pattern.permute.xlu1 %v1280_v6  ;;  %879 = vmatpush.msra.mxu1 %v864_v15  ;;  %v863_v6 = vld [vmem:[%s1922_s6 + $0x48] sm:$0xff] }
  0xe6   : > { %571 = vperm.xlu1 %1255, %v1609_v53   ;;  %1181 = vmatpush.msra.mxu3 %v863_v6 }
  0xe7   : > { %v1686_v16 = vadd.f32 %v1029_v57, %v1011_v59  ;;  %v723_v1 = vadd.f32 %v707_v12, %v625_v9  ;;  %1256 = vset.pattern.permute.xlu2 %v1277_v0  ;;  %880 = vmatpush.msra.mxu1 %v863_v6  ;;  %v861_v0 = vld [vmem:[%s1922_s6 + $0x38] sm:$0xff] }
  0xe8   : > { %v350_v36 = vpop.permute.xlu2 %349  ;;  %669 = vperm.xlu2 %1256, %v1609_v53   ;;  %1182 = vmatpush.msra.mxu3 %v862_v44 }
  0xe9   : > { %v739_v18 = vmax.f32 %v723_v1, 0.0  ;;  %881 = vmatpush.msra.mxu1 %v862_v44  ;;  %v945_v29 = vmul.f32 %v1454_v34, %v350_v36  ;;  %v412_v46 = vmul.f32 %v1459_v35, %v350_v36  ;;  %v355_v44 = vpop.permute.xlu0 %354 }
  0xea   : > { %1183 = vmatpush.msra.mxu3 %v861_v0 }
  0xeb   : > { %795 = vmatmul.f32.gmra.mxu0 %v739_v18  ;;  %882 = vmatpush.msra.mxu1 %v861_v0  ;;  %v431_v28 = vadd.f32 %v1471_v41, %v412_v46 }
  0xec   : > { %1184 = vmatpush.msra.mxu3 %v860_v24 }
  0xed   : > { %v458_v53 = vpop.permute.xlu1 %457  ;;  %883 = vmatpush.msra.mxu1 %v860_v24 }
  0xee   : > { %v962_v21 = vmul.f32 %v1449_v33, %v458_v53  ;;  %1185 = vmatpush.msra.mxu3 %v859_v25  ;;  %v512_v55 = vmul.f32 %v1481_v45, %v458_v53 }
  0xef   : > { %884 = vmatpush.msra.mxu1 %v859_v25 }
  0xf0   : > { %v978_v10 = vadd.f32 %v962_v21, %v944_v19  ;;  %1186 = vmatpush.msra.mxu3 %v858_v38  ;;  %v528_v2 = vadd.f32 %v512_v55, %v430_v17 }
  0xf1   : > { %v462_v31 = vpop.permute.xlu2 %461  ;;  %885 = vmatpush.msra.mxu1 %v858_v38  ;;  %v564_v46 = vpop.permute.xlu0 %563 }
  0xf2   : > { %v963_v32 = vmul.f32 %v1449_v33, %v462_v31  ;;  %v1012_v37 = vadd.f32 %v996_v20, %v978_v10  ;;  %1187 = vmatpush.msra.mxu3 %v857_v42  ;;  %v513_v59 = vmul.f32 %v1481_v45, %v462_v31  ;;  %v626_v15 = vadd.f32 %v610_v63, %v528_v2 }
  0xf3   : > { %886 = vmatpush.msra.mxu1 %v857_v42  ;;  %v522_v20 = vmul.f32 %v1481_v45, %v1592_v27  ;;  %v718_v10 = vmul.f32 %v1497_v49, %v1628_v14  ;;  %v1040_v31 = vmul.f32 %v1502_v50, %v1628_v14 }
  0xf4   : > { %v979_v39 = vadd.f32 %v963_v32, %v945_v29  ;;  %1188 = vmatpush.msra.mxu3 %v856_v30  ;;  %v529_v7 = vadd.f32 %v513_v59, %v431_v28  ;;  %v413_v28 = vmul.f32 %v1459_v35, %v355_v44 }
  0xf5   : > { %887 = vmatpush.msra.mxu1 %v856_v30 }
  0xf6   : > { %v395_v52 = vpop.permute.xlu1 %394  ;;  %1189 = vmatpush.msra.mxu3 %v855_v40 }
  0xf7   : > { %v954_v54 = vmul.f32 %v1454_v34, %v395_v52  ;;  %888 = vmatpush.msra.mxu1 %v855_v40  ;;  %v421_v1 = vmul.f32 %v1459_v35, %v395_v52 }
  0xf8   : > { %1190 = vmatpush.msra.mxu3 %v854_v4 }
  0xf9   : > { %v988_v56 = vadd.f32 %v972_v22, %v954_v54  ;;  %889 = vmatpush.msra.mxu1 %v854_v4  ;;  %v440_v21 = vadd.f32 %v1471_v41, %v421_v1  ;;  %v946_v22 = vmul.f32 %v1454_v34, %v355_v44  ;;  %v998_v54 = vmul.f32 %v1492_v48, %v564_v46 }
  0xfa   : > { %v560_v60 = vpop.permute.xlu2 %559  ;;  %v432_v4 = vadd.f32 %v1471_v41, %v413_v28 }
  0xfb   : > { %v997_v62 = vmul.f32 %v1492_v48, %v560_v60  ;;  %v611_v8 = vmul.f32 %v1487_v47, %v560_v60  ;;  %v538_v32 = vadd.f32 %v522_v20, %v440_v21 }
  0xfd   : > { %v1013_v3 = vadd.f32 %v997_v62, %v979_v39  ;;  %v627_v36 = vadd.f32 %v611_v8, %v529_v7  ;;  %v612_v8 = vmul.f32 %v1487_v47, %v564_v46 }
  0xff   : > { %v654_v9 = vpop.permute.xlu1 %653 }
 0x100   : > { %v708_v12 = vmul.f32 %v1497_v49, %v654_v9  ;;  %v1030_v57 = vmul.f32 %v1502_v50, %v654_v9 }
 0x102   : > { %v1744_v6 = vadd.f32 %v1030_v57, %v1012_v37  ;;  %v724_v18 = vadd.f32 %v708_v12, %v626_v15 }
 0x103   : > { %v658_v61 = vpop.permute.xlu2 %657 }
 0x104   : > { %v709_v0 = vmul.f32 %v1497_v49, %v658_v61  ;;  %v1031_v53 = vmul.f32 %v1502_v50, %v658_v61  ;;  %v740_v19 = vmax.f32 %v724_v18, 0.0 }
 0x106   : > { %v1751_v24 = vadd.f32 %v1031_v53, %v1013_v3  ;;  %798 = vmatmul.f32.gmra.mxu0 %v740_v19  ;;  %v725_v25 = vadd.f32 %v709_v0, %v627_v36 }
 0x108   : > { %v596_v29 = vpop.permute.xlu1 %595  ;;  %v741_v39 = vmax.f32 %v725_v25, 0.0 }
 0x109   : > { %v620_v37 = vmul.f32 %v1487_v47, %v596_v29  ;;  %v1006_v38 = vmul.f32 %v1492_v48, %v596_v29 }
 0x10b   : > { %v636_v27 = vadd.f32 %v620_v37, %v538_v32  ;;  %v1022_v42 = vadd.f32 %v1006_v38, %v988_v56  ;;  %v1768_v56 = vld [vmem:[%s1921_s5] ss:$0 sm:$0xff] }
 0x10c   : > { %v466_v26 = vpop.permute.xlu2 %465 }
 0x10d   : > { %v964_v52 = vmul.f32 %v1449_v33, %v466_v26  ;;  %v734_v30 = vadd.f32 %v718_v10, %v636_v27  ;;  %v1762_v55 = vadd.f32 %v1040_v31, %v1022_v42  ;;  %v514_v60 = vmul.f32 %v1481_v45, %v466_v26 }
 0x10e   : > { %801 = vmatmul.f32.gmra.mxu0 %v741_v39 }
 0x10f   : > { %v750_v14 = vmax.f32 %v734_v30, 0.0  ;;  %v980_v40 = vadd.f32 %v964_v52, %v946_v22  ;;  %v530_v7 = vadd.f32 %v514_v60, %v432_v4  ;;  %v470_v52 = vpop.permute.xlu0 %469 }
 0x111   : > { %v400_v17 = vpop.permute.xlu1 %399  ;;  %828 = vmatmul.f32.gmra.mxu2 %v750_v14  ;;  %v1014_v59 = vadd.f32 %v998_v54, %v980_v40  ;;  %v628_v44 = vadd.f32 %v612_v8, %v530_v7 }
 0x112   : > { %v955_v15 = vmul.f32 %v1454_v34, %v400_v17  ;;  %v422_v29 = vmul.f32 %v1459_v35, %v400_v17 }
 0x114   : > { %v441_v38 = vadd.f32 %v1471_v41, %v422_v29 }
 0x115   : > { %v405_v62 = vpop.permute.xlu2 %404 }
 0x117   : > { %v814_v63 = vpop.f32.mrf.mxu2 }
 0x118   : > { %v815_v2 = vadd.f32 %v1768_v56, %v814_v63  ;;  %v956_v63 = vmul.f32 %v1454_v34, %v405_v62 }
 0x119   : > { %v790_v3 = vpop.f32.mrf.mxu0 }
 0x11a   : > { %v846_v9 = vmax.f32 %v815_v2, 0.0  ;;  %v791_v12 = vadd.f32 %v1768_v56, %v790_v3  ;;  %v502_v57 = vpop.permute.xlu1 %501 }
 0x11b   : > { %v973_v1 = vmul.f32 %v1449_v33, %v502_v57  ;;  %v523_v32 = vmul.f32 %v1481_v45, %v502_v57 }
 0x11c   : > { %v838_v36 = vmax.f32 %v791_v12, 0.0  ;;  %914 = vmatmul.f32.vlgmr.msra.gmra.mxu3 %v846_v9  ;;  %v474_v4 = vpop.permute.xlu0 %473 }
 0x11d   : > { %v989_v18 = vadd.f32 %v973_v1, %v955_v15  ;;  %v539_v27 = vadd.f32 %v523_v32, %v441_v38  ;;  %v966_v8 = vmul.f32 %v1449_v33, %v474_v4  ;;  %v965_v1 = vmul.f32 %v1449_v33, %v470_v52 }
 0x11e   : > { %v662_v61 = vpop.permute.xlu2 %661  ;;  %890 = vmatmul.f32.vlgmr.msra.gmra.mxu1 %v838_v36  ;;  %v423_v36 = vmul.f32 %v1459_v35, %v405_v62 }
 0x11f   : > { %v710_v0 = vmul.f32 %v1497_v49, %v662_v61  ;;  %v1032_v53 = vmul.f32 %v1502_v50, %v662_v61 }
 0x121   : > { %v1779_v19 = vadd.f32 %v1032_v53, %v1014_v59  ;;  %v726_v20 = vadd.f32 %v710_v0, %v628_v44 }
 0x123   : > { %v600_v21 = vpop.permute.xlu1 %599  ;;  %v742_v25 = vmax.f32 %v726_v20, 0.0 }
 0x124   : > { %v1007_v10 = vmul.f32 %v1492_v48, %v600_v21  ;;  %v621_v39 = vmul.f32 %v1487_v47, %v600_v21  ;;  %v442_v21 = vadd.f32 %v1471_v41, %v423_v36  ;;  %v516_v36 = vmul.f32 %v1481_v45, %v474_v4 }
 0x125   : > { %804 = vmatmul.f32.gmra.mxu0 %v742_v25 }
 0x126   : > { %v1023_v31 = vadd.f32 %v1007_v10, %v989_v18  ;;  %v637_v22 = vadd.f32 %v621_v39, %v539_v27 }
 0x127   : > { %v604_v37 = vpop.permute.xlu2 %603 }
 0x128   : > { %v1008_v3 = vmul.f32 %v1492_v48, %v604_v37 }
 0x12c   : > { %v698_v42 = vpop.permute.xlu1 %697 }
 0x12d   : > { %v719_v26 = vmul.f32 %v1497_v49, %v698_v42  ;;  %v1041_v46 = vmul.f32 %v1502_v50, %v698_v42 }
 0x12f   : > { %v1788_v30 = vadd.f32 %v1041_v46, %v1023_v31  ;;  %v735_v54 = vadd.f32 %v719_v26, %v637_v22  ;;  %v568_v40 = vpop.permute.xlu2 %567  ;;  %v622_v31 = vmul.f32 %v1487_v47, %v604_v37 }
 0x130   : > { %v999_v61 = vmul.f32 %v1492_v48, %v568_v40 }
 0x131   : > { %v751_v14 = vmax.f32 %v735_v54, 0.0 }
 0x132   : > { %v817_v17 = vpop.f32.mrf.mxu2 }
 0x133   : > { %v818_v28 = vadd.f32 %v1768_v56, %v817_v17  ;;  %831 = vmatmul.f32.gmra.mxu2 %v751_v14 }
 0x135   : > { %v847_v59 = vmax.f32 %v818_v28, 0.0  ;;  %v506_v60 = vpop.permute.xlu1 %505 }
 0x136   : > { %v974_v2 = vmul.f32 %v1449_v33, %v506_v60  ;;  %v524_v0 = vmul.f32 %v1481_v45, %v506_v60  ;;  %v613_v60 = vmul.f32 %v1487_v47, %v568_v40 }
 0x137   : > { %917 = vmatmul.f32.gmra.mxu3 %v847_v59 }
 0x138   : > { %v990_v7 = vadd.f32 %v974_v2, %v956_v63  ;;  %v540_v29 = vadd.f32 %v524_v0, %v442_v21 }
 0x139   : > { %v365_v9 = vpop.permute.xlu2 %364 }
 0x13a   : > { %v1024_v12 = vadd.f32 %v1008_v3, %v990_v7  ;;  %v948_v57 = vmul.f32 %v1454_v34, %v365_v9  ;;  %v638_v27 = vadd.f32 %v622_v31, %v540_v29  ;;  %v415_v3 = vmul.f32 %v1459_v35, %v365_v9 }
 0x13c   : > { %v982_v15 = vadd.f32 %v966_v8, %v948_v57 }
 0x13e   : > { %v360_v18 = vpop.permute.xlu1 %359 }
 0x13f   : > { %v947_v44 = vmul.f32 %v1454_v34, %v360_v18  ;;  %v414_v33 = vmul.f32 %v1459_v35, %v360_v18  ;;  %v515_v34 = vmul.f32 %v1481_v45, %v470_v52 }
 0x141   : > { %v981_v53 = vadd.f32 %v965_v1, %v947_v44  ;;  %v820_v20 = vpop.f32.mrf.mxu2  ;;  %v433_v42 = vadd.f32 %v1471_v41, %v414_v33  ;;  %v434_v1 = vadd.f32 %v1471_v41, %v415_v3 }
 0x142   : > { %v821_v25 = vadd.f32 %v1768_v56, %v820_v20  ;;  %v670_v40 = vpop.permute.xlu2 %669 }
 0x143   : > { %v1015_v10 = vadd.f32 %v999_v61, %v981_v53  ;;  %v531_v28 = vadd.f32 %v515_v34, %v433_v42  ;;  %v532_v44 = vadd.f32 %v516_v36, %v434_v1  ;;  %v712_v9 = vmul.f32 %v1497_v49, %v670_v40 }
 0x144   : > { %v848_v62 = vmax.f32 %v821_v25, 0.0  ;;  %v1034_v53 = vmul.f32 %v1502_v50, %v670_v40 }
 0x145   : > { %v629_v2 = vadd.f32 %v613_v60, %v531_v28 }
 0x146   : > { %v793_v32 = vpop.f32.mrf.mxu0  ;;  %920 = vmatmul.f32.gmra.mxu3 %v848_v62 }
 0x147   : > { %v794_v38 = vadd.f32 %v1768_v56, %v793_v32  ;;  %v702_v39 = vpop.permute.xlu1 %701 }
 0x148   : > { %v720_v22 = vmul.f32 %v1497_v49, %v702_v39  ;;  %v1042_v26 = vmul.f32 %v1502_v50, %v702_v39 }
 0x149   : > { %v839_v46 = vmax.f32 %v794_v38, 0.0  ;;  %v823_v54 = vpop.f32.mrf.mxu2 }
 0x14a   : > { %v1810_v37 = vadd.f32 %v1042_v26, %v1024_v12  ;;  %v824_v14 = vadd.f32 %v1768_v56, %v823_v54  ;;  %v736_v17 = vadd.f32 %v720_v22, %v638_v27  ;;  %v1835_v27 = vld [vmem:[%s1923_s7] ss:$0 sm:$0xff] }
 0x14b   : > { %893 = vmatmul.f32.gmra.mxu1 %v839_v46 }
 0x14c   : > { %v849_v52 = vmax.f32 %v824_v14, 0.0  ;;  %v752_v59 = vmax.f32 %v736_v17, 0.0 }
 0x14e   : > { %834 = vmatmul.f32.gmra.mxu2 %v752_v59  ;;  %923 = vmatmul.f32.gmra.mxu3 %v849_v52 }
 0x14f   : > { %v666_v63 = vpop.permute.xlu1 %665 }
 0x150   : > { %v711_v7 = vmul.f32 %v1497_v49, %v666_v63  ;;  %v1033_v8 = vmul.f32 %v1502_v50, %v666_v63 }
 0x152   : > { %v1817_v12 = vadd.f32 %v1033_v8, %v1015_v10  ;;  %v727_v57 = vadd.f32 %v711_v7, %v629_v2 }
 0x154   : > { %v743_v18 = vmax.f32 %v727_v57, 0.0 }
 0x156   : > { %807 = vmatmul.f32.gmra.mxu0 %v743_v18 }
 0x158   : > { %v572_v61 = vpop.permute.xlu1 %571 }
 0x159   : > { %v614_v0 = vmul.f32 %v1487_v47, %v572_v61  ;;  %v1000_v35 = vmul.f32 %v1492_v48, %v572_v61 }
 0x15b   : > { %v630_v20 = vadd.f32 %v614_v0, %v532_v44  ;;  %v1016_v21 = vadd.f32 %v1000_v35, %v982_v15 }
 0x15d   : > { %v1825_v25 = vadd.f32 %v1034_v53, %v1016_v21  ;;  %v728_v41 = vadd.f32 %v712_v9, %v630_v20 }
 0x15f   : > { %v744_v10 = vmax.f32 %v728_v41, 0.0 }
 0x160   : > { %v826_v45 = vpop.f32.mrf.mxu2 }
 0x161   : > { %v827_v4 = vadd.f32 %v1768_v56, %v826_v45  ;;  %810 = vmatmul.f32.gmra.mxu0 %v744_v10 }
 0x163   : > { %v850_v29 = vmax.f32 %v827_v4, 0.0 }
 0x165   : > { %926 = vmatmul.f32.gmra.mxu3 %v850_v29 }
 0x168   : > { %v796_v31 = vpop.f32.mrf.mxu0 }
 0x169   : > { %v797_v47 = vadd.f32 %v1768_v56, %v796_v31 }
 0x16b   : > { %v840_v48 = vmax.f32 %v797_v47, 0.0 }
 0x16d   : > { %896 = vmatmul.f32.gmra.mxu1 %v840_v48 }
 0x183   : > { %v799_v49 = vpop.f32.mrf.mxu0 }
 0x184   : > { %v800_v50 = vadd.f32 %v1768_v56, %v799_v49 }
 0x186   : > { %v841_v15 = vmax.f32 %v800_v50, 0.0 }
 0x188   : > { %899 = vmatmul.f32.gmra.mxu1 %v841_v15 }
 0x18b   : > { %v802_v33 = vpop.f32.mrf.mxu0 }
 0x18c   : > { %v803_v62 = vadd.f32 %v1768_v56, %v802_v33 }
 0x18e   : > { %v842_v32 = vmax.f32 %v803_v62, 0.0 }
 0x190   : > { %902 = vmatmul.f32.gmra.mxu1 %v842_v32 }
 0x194   : > { %v829_v34 = vpop.f32.mrf.mxu2 }
 0x195   : > { %v830_v38 = vadd.f32 %v1768_v56, %v829_v34 }
 0x197   : > { %v851_v39 = vmax.f32 %v830_v38, 0.0 }
 0x199   : > { %929 = vmatmul.f32.gmra.mxu3 %v851_v39 }
 0x19b   : > { %v891_v42 = vpop.f32.mrf.mxu1 }
 0x19c   : > { %v892_v22 = vadd.f32 %v1835_v27, %v891_v42 }
 0x19e   : > { %v1059_v26 = vadd.f32 %v1537_v23, %v892_v22 }
 0x19f   : > { %v915_v46 = vpop.f32.mrf.mxu3 }
 0x1a0   : > { %1076 = vst.msk [vmem:[%s1843_s11] sm:$0xff] %vm1075_vm0, %v1059_v26  ;;  %v916_v54 = vadd.f32 %v1835_v27, %v915_v46 }
 0x1a2   : > { %v1067_v14 = vadd.f32 %v1524_v11, %v916_v54  ;;  %v805_v17 = vpop.f32.mrf.mxu0 }
 0x1a3   : > { %v806_v28 = vadd.f32 %v1768_v56, %v805_v17 }
 0x1a4   : > { %1084 = vst.msk [vmem:[%s1843_s11 + $0x40] sm:$0xff] %vm1075_vm0, %v1067_v14 }
 0x1a5   : > { %v843_v52 = vmax.f32 %v806_v28, 0.0 }
 0x1a7   : > { %905 = vmatmul.f32.gmra.mxu1 %v843_v52 }
 0x1b6   : > { %v832_v59 = vpop.f32.mrf.mxu2 }
 0x1b7   : > { %v833_v23 = vadd.f32 %v1768_v56, %v832_v59 }
 0x1b9   : > { %v852_v60 = vmax.f32 %v833_v23, 0.0 }
 0x1ba   : > { %v918_v63 = vpop.f32.mrf.mxu3 }
 0x1bb   : > { %v919_v2 = vadd.f32 %v1835_v27, %v918_v63  ;;  %932 = vmatmul.f32.gmra.mxu3 %v852_v60 }
 0x1bd   : > { %v1068_v3 = vadd.f32 %v1573_v5, %v919_v2 }
 0x1bf   : > { %1085 = vst.msk [vmem:[%s1843_s11 + $0x48] sm:$0xff] %vm1075_vm0, %v1068_v3 }
 0x1c8   : > { %v894_v11 = vpop.f32.mrf.mxu1 }
 0x1c9   : > { %v895_v7 = vadd.f32 %v1835_v27, %v894_v11  ;;  %v921_v8 = vpop.f32.mrf.mxu3 }
 0x1ca   : > { %v922_v57 = vadd.f32 %v1835_v27, %v921_v8 }
 0x1cb   : > { %v1060_v1 = vadd.f32 %v1626_v13, %v895_v7 }
 0x1cc   : > { %v1069_v36 = vadd.f32 %v1602_v43, %v922_v57 }
 0x1cd   : > { %1077 = vst.msk [vmem:[%s1843_s11 + $0x8] sm:$0xff] %vm1075_vm0, %v1060_v1 }
 0x1ce   : > { %1086 = vst.msk [vmem:[%s1843_s11 + $0x50] sm:$0xff] %vm1075_vm0, %v1069_v36 }
 0x1d1   : > { %v835_v18 = vpop.f32.mrf.mxu2  ;;  %v924_v40 = vpop.f32.mrf.mxu3 }
 0x1d2   : > { %v836_v5 = vadd.f32 %v1768_v56, %v835_v18  ;;  %v925_v44 = vadd.f32 %v1835_v27, %v924_v40 }
 0x1d3   : > { %v808_v61 = vpop.f32.mrf.mxu0 }
 0x1d4   : > { %v853_v0 = vmax.f32 %v836_v5, 0.0  ;;  %v1070_v35 = vadd.f32 %v1615_v58, %v925_v44  ;;  %v809_v9 = vadd.f32 %v1768_v56, %v808_v61 }
 0x1d6   : > { %1087 = vst.msk [vmem:[%s1843_s11 + $0x58] sm:$0xff] %vm1075_vm0, %v1070_v35  ;;  %v844_v43 = vmax.f32 %v809_v9, 0.0  ;;  %935 = vmatmul.f32.gmra.mxu3 %v853_v0 }
 0x1d8   : > { %908 = vmatmul.f32.gmra.mxu1 %v844_v43 }
 0x1de   : > { %v811_v13 = vpop.f32.mrf.mxu0 }
 0x1df   : > { %v812_v53 = vadd.f32 %v1768_v56, %v811_v13 }
 0x1e1   : > { %v845_v20 = vmax.f32 %v812_v53, 0.0 }
 0x1e3   : > { %911 = vmatmul.f32.gmra.mxu1 %v845_v20 }
 0x1e8   : > { %v927_v21 = vpop.f32.mrf.mxu3 }
 0x1e9   : > { %v928_v41 = vadd.f32 %v1835_v27, %v927_v21 }
 0x1ea   : > { %v897_v10 = vpop.f32.mrf.mxu1 }
 0x1eb   : > { %v1071_v58 = vadd.f32 %v1652_v51, %v928_v41  ;;  %v898_v45 = vadd.f32 %v1835_v27, %v897_v10 }
 0x1ed   : > { %1088 = vst.msk [vmem:[%s1843_s11 + $0x60] sm:$0xff] %vm1075_vm0, %v1071_v58  ;;  %v1061_v4 = vadd.f32 %v1686_v16, %v898_v45 }
 0x1ef   : > { %1078 = vst.msk [vmem:[%s1843_s11 + $0x10] sm:$0xff] %vm1075_vm0, %v1061_v4 }
 0x205   : > { %v900_v56 = vpop.f32.mrf.mxu1 }
 0x206   : > { %v901_v29 = vadd.f32 %v1835_v27, %v900_v56 }
 0x208   : > { %v1062_v31 = vadd.f32 %v1744_v6, %v901_v29 }
 0x20a   : > { %1079 = vst.msk [vmem:[%s1843_s11 + $0x18] sm:$0xff] %vm1075_vm0, %v1062_v31 }
 0x20d   : > { %v903_v47 = vpop.f32.mrf.mxu1 }
 0x20e   : > { %v904_v51 = vadd.f32 %v1835_v27, %v903_v47 }
 0x210   : > { %v1063_v48 = vadd.f32 %v1751_v24, %v904_v51 }
 0x212   : > { %1080 = vst.msk [vmem:[%s1843_s11 + $0x20] sm:$0xff] %vm1075_vm0, %v1063_v48 }
 0x21c   : > { %v930_v49 = vpop.f32.mrf.mxu3 }
 0x21d   : > { %v931_v16 = vadd.f32 %v1835_v27, %v930_v49 }
 0x21f   : > { %v1072_v50 = vadd.f32 %v1762_v55, %v931_v16 }
 0x221   : > { %1089 = vst.msk [vmem:[%s1843_s11 + $0x68] sm:$0xff] %vm1075_vm0, %v1072_v50 }
 0x224   : > { %v906_v6 = vpop.f32.mrf.mxu1 }
 0x225   : > { %v907_v15 = vadd.f32 %v1835_v27, %v906_v6 }
 0x227   : > { %v1064_v33 = vadd.f32 %v1779_v19, %v907_v15 }
 0x229   : > { %1081 = vst.msk [vmem:[%s1843_s11 + $0x28] sm:$0xff] %vm1075_vm0, %v1064_v33 }
 0x23e   : > { %v933_v24 = vpop.f32.mrf.mxu3 }
 0x23f   : > { %v934_v62 = vadd.f32 %v1835_v27, %v933_v24 }
 0x241   : > { %v1073_v32 = vadd.f32 %v1788_v30, %v934_v62 }
 0x243   : > { %1090 = vst.msk [vmem:[%s1843_s11 + $0x70] sm:$0xff] %vm1075_vm0, %v1073_v32 }
 0x255   : > { %v909_v34 = vpop.f32.mrf.mxu1 }
 0x256   : > { %v910_v55 = vadd.f32 %v1835_v27, %v909_v34 }
 0x258   : > { %v1065_v38 = vadd.f32 %v1817_v12, %v910_v55 }
 0x259   : > { %v936_v39 = vpop.f32.mrf.mxu3 }
 0x25a   : > { %1082 = vst.msk [vmem:[%s1843_s11 + $0x30] sm:$0xff] %vm1075_vm0, %v1065_v38  ;;  %v937_v19 = vadd.f32 %v1835_v27, %v936_v39 }
 0x25c   : > { %v1074_v42 = vadd.f32 %v1810_v37, %v937_v19 }
 0x25e   : > { %1091 = vst.msk [vmem:[%s1843_s11 + $0x78] sm:$0xff] %vm1075_vm0, %v1074_v42 }
 0x260   : > { %v912_v22 = vpop.f32.mrf.mxu1 }
 0x261   : > { %v913_v26 = vadd.f32 %v1835_v27, %v912_v22 }
 0x263   : > { %v1066_v30 = vadd.f32 %v1825_v25, %v913_v26 }
 0x265   : > { %1083 = vst.msk [vmem:[%s1843_s11 + $0x38] sm:$0xff] %vm1075_vm0, %v1066_v30 }
 0x266 PF: > { %s18_s27 = sadd.s32 1, %s1275_s27  }
 0x267   : > { %p15_p4 = scmp.ge.s32.totalorder %s18_s27, 4  }
 0x269   :  { %17 = sbr.rel (!%p15_p4) target bundleno = 1 (0x1), region = 82 }

</bundles_post_ra>
